<compile_context>
chip_gen: v6e
topology: v6e:2x2x1
jax: 0.10.0
libtpu: 0.0.40
codegen_flags: <defaults>
</compile_context>

<pallas_src>
import jax
import jax.numpy as jnp
from jax import lax
from jax.experimental import pallas as pl
from jax.experimental.pallas import tpu as pltpu

EPS = 1e-5


def mlp_kernel(x_ref, w1_ref, gamma_ref, beta_ref, w2_ref, o_ref):
    """One hidden tile: Linear1 slice -> BN(train) -> ReLU -> Linear2 partial."""
    j = pl.program_id(1)  # hidden-tile index within this core split

    @pl.when(j == 0)
    def _init():
        o_ref[...] = jnp.zeros_like(o_ref)

    # Linear-1 slice on the MXU: (B, dim) @ (dim, th) -> f32.
    # The Linear-1 bias is omitted on purpose: training-mode BatchNorm subtracts
    # the batch mean, which cancels any per-feature constant exactly.
    h = jnp.dot(x_ref[...], w1_ref[...], preferred_element_type=jnp.float32)

    # BatchNorm1d (training mode, biased variance) with centered two-pass stats.
    mean = jnp.mean(h, axis=0, keepdims=True)
    d = h - mean
    var = jnp.mean(d * d, axis=0, keepdims=True)

    # Fused BN affine + ReLU: hn = max(d * a + beta, 0), a = gamma/sqrt(var+eps).
    a = gamma_ref[...].astype(jnp.float32) * lax.rsqrt(var + EPS)
    hn = jnp.maximum(d * a + beta_ref[...].astype(jnp.float32), 0.0)

    # Linear-2 partial product accumulated into the resident f32 output slab.
    o_ref[...] += jnp.dot(hn.astype(w2_ref.dtype), w2_ref[...],
                          preferred_element_type=jnp.float32)


def _tpu_vmem_capacity_bytes(default=64 * 1024 * 1024):
    """Best-effort physical per-core VMEM size (conservative fallback)."""
    try:
        return int(pltpu.get_tpu_info().vmem_capacity_bytes)
    except Exception:
        return default


def _num_tensorcores():
    """Best-effort TensorCore-per-device count (v7x has 2); falls back to 1."""
    try:
        info = pltpu.get_tpu_info()
        for name in ("num_cores", "core_count", "num_tensorcores",
                     "tensorcore_count"):
            n = getattr(info, name, None)
            if n:
                return int(n)
    except Exception:
        pass
    try:
        n = getattr(jax.devices()[0], "num_cores", None)
        if n:
            return int(n)
    except Exception:
        pass
    return 1


def _pick_block_h(B, dim, proj, hidden, vmem_budget, cbytes=2):
    """Largest lane-aligned hidden tile whose working set fits the budget."""
    cands = [t for t in range(128, hidden + 1, 128) if hidden % t == 0]
    if not cands:
        return hidden  # tiny hidden: single un-tiled step
    resident = B * dim * cbytes + B * proj * 4          # x (single-buffered) + out slab
    best = cands[0]
    for t in cands:
        per_step = 2 * (dim * t * cbytes) + 2 * (t * proj * cbytes) + 4 * t * 4
        temps = 3 * B * t * 4                            # h, (h-mean), relu output
        if resident + per_step + temps <= vmem_budget:
            best = t
    return best


def mlp_forward(x, w1_t, b1, gamma, beta, w2_t, b2, *,
                block_h=None, num_core_splits=None,
                compute_dtype=jnp.bfloat16, out_dtype=None):
    """Forward pass of MLP(dim, proj, hidden) on a batch x of shape (B, dim).

    Weights are passed pre-transposed: w1_t (dim, hidden), w2_t (hidden, proj).
    b1 is accepted for module fidelity but is mathematically a no-op under
    training-mode BatchNorm, so it is not fed to the kernel.
    """
    del b1  # cancelled exactly by the training-mode BN mean subtraction
    B, dim = x.shape
    hidden, proj = w2_t.shape
    assert w1_t.shape == (dim, hidden)
    out_dtype = out_dtype or x.dtype
    cbytes = jnp.dtype(compute_dtype).itemsize

    # --- per-generation VMEM budget (leave headroom; never the full 64 MiB) --
    vmem_cap = _tpu_vmem_capacity_bytes()
    vmem_limit = int(min(max(vmem_cap - 8 * 1024 * 1024, 32 * 1024 * 1024),
                         100 * 1024 * 1024))

    # --- hidden tile size -----------------------------------------------------
    if block_h is None:
        block_h = _pick_block_h(B, dim, proj, hidden,
                                vmem_budget=int(0.75 * vmem_limit),
                                cbytes=cbytes)
    th = min(block_h, hidden)
    assert hidden % th == 0, "hidden must be divisible by the hidden tile size"
    assert th == hidden or th % 128 == 0, "hidden tile must be lane-aligned (x128)"
    n_h = hidden // th

    # --- megacore split (v7x: 2 TCs; harmless no-op on single-TC parts) -------
    P = num_core_splits if num_core_splits is not None else _num_tensorcores()
    P = max(1, min(int(P), n_h))
    while n_h % P:
        P -= 1
    n_h_per = n_h // P

    # --- operand preparation ---------------------------------------------------
    xc = x.astype(compute_dtype)
    # Pre-block W1 to (n_h, dim, th): each grid step's W1 tile becomes one
    # contiguous DMA run (one-time reshape/transpose outside the kernel).
    w1b = w1_t.astype(compute_dtype).reshape(dim, n_h, th).transpose(1, 0, 2)
    w2c = w2_t.astype(compute_dtype)
    gamma2d = gamma.astype(jnp.float32).reshape(1, hidden)
    beta2d = beta.astype(jnp.float32).reshape(1, hidden)

    def hb(p, j):  # global hidden-tile index
        return p * n_h_per + j

    grid_spec = pltpu.PrefetchScalarGridSpec(
        num_scalar_prefetch=0,
        grid=(P, n_h_per),
        in_specs=[
            # x: resident, constant block index -> single-buffered.
            pl.BlockSpec((B, dim), lambda p, j: (0, 0),
                         pipeline_mode=pl.Buffered(1)),
            # W1 tile (pre-blocked, contiguous), streamed once, double-buffered.
            pl.BlockSpec((None, dim, th), lambda p, j: (hb(p, j), 0, 0)),
            pl.BlockSpec((1, th), lambda p, j: (0, hb(p, j))),    # gamma tile
            pl.BlockSpec((1, th), lambda p, j: (0, hb(p, j))),    # beta tile
            pl.BlockSpec((th, proj), lambda p, j: (hb(p, j), 0)),  # W2 row tile
        ],
        # One resident f32 partial slab per core split; constant index over the
        # hidden axis -> single-buffered.
        out_specs=pl.BlockSpec((None, B, proj), lambda p, j: (p, 0, 0),
                               pipeline_mode=pl.Buffered(1)),
    )

    partials = pl.pallas_call(
        mlp_kernel,
        out_shape=jax.ShapeDtypeStruct((P, B, proj), jnp.float32),
        grid_spec=grid_spec,
        compiler_params=pltpu.CompilerParams(
            # hidden axis carries the resident accumulator -> "arbitrary";
            # the core-split axis is independent -> "parallel".
            dimension_semantics=("parallel", "arbitrary"),
            vmem_limit_bytes=vmem_limit,
        ),
    )(xc, w1b, gamma2d, beta2d, w2c)

    # Tiny (B, proj) epilogue: sum core-split partials, add Linear-2 bias, cast.
    out = partials.sum(axis=0) + b2.astype(jnp.float32).reshape(1, proj)
    return out.astype(out_dtype)


def init_params(key, dim, projection_size, hidden_size):
    """PyTorch-style init: Linear uniform +/- 1/sqrt(fan_in); BN gamma=1, beta=0."""
    k1, k2, k3, k4 = jax.random.split(key, 4)
    lim1 = 1.0 / (dim ** 0.5)
    lim2 = 1.0 / (hidden_size ** 0.5)
    # Stored already transposed for the kernel: (dim, hidden) and (hidden, proj).
    w1_t = jax.random.uniform(k1, (dim, hidden_size), jnp.float32, -lim1, lim1)
    b1 = jax.random.uniform(k2, (1, hidden_size), jnp.float32, -lim1, lim1)
    gamma = jnp.ones((hidden_size,), jnp.float32)
    beta = jnp.zeros((hidden_size,), jnp.float32)
    w2_t = jax.random.uniform(k3, (hidden_size, projection_size), jnp.float32, -lim2, lim2)
    b2 = jax.random.uniform(k4, (1, projection_size), jnp.float32, -lim2, lim2)
    return w1_t, b1, gamma, beta, w2_t, b2


if __name__ == "__main__":
    # Small, MXU/lane-aligned shapes consistent with the module
    # (real BYOL: dim=2048, hidden=4096, proj=256; shrunk here). B=128 keeps
    # the MXU M dimension reasonably occupied even in this small test.
    B, DIM, HIDDEN, PROJ = 128, 256, 512, 128
    BLOCK_H = 256  # 2 hidden tiles -> exercises the init/accumulate path

    key = jax.random.PRNGKey(0)
    kx, kp = jax.random.split(key)
    x = jax.random.normal(kx, (B, DIM), jnp.float32)
    w1_t, b1, gamma, beta, w2_t, b2 = init_params(kp, DIM, PROJ, HIDDEN)

    out = mlp_forward(x, w1_t, b1, gamma, beta, w2_t, b2, block_h=BLOCK_H)
    jax.block_until_ready(out)

    # --- Reference 1: mirrors the kernel's bf16 matmul path (tight check). ---
    xc = x.astype(jnp.bfloat16)
    h = jnp.dot(xc, w1_t.astype(jnp.bfloat16), preferred_element_type=jnp.float32)
    m = jnp.mean(h, axis=0, keepdims=True)
    d = h - m
    v = jnp.mean(d * d, axis=0, keepdims=True)
    a = gamma.reshape(1, -1) * jax.lax.rsqrt(v + EPS)
    hn = jnp.maximum(d * a + beta.reshape(1, -1), 0.0)
    ref_bf16 = jnp.dot(hn.astype(jnp.bfloat16), w2_t.astype(jnp.bfloat16),
                       preferred_element_type=jnp.float32) + b2
    assert jnp.allclose(out, ref_bf16, atol=2e-3, rtol=2e-3), "mismatch vs bf16 reference"

    # --- Reference 2: pure-f32 PyTorch math incl. the BN-cancelled bias b1. ---
    hf = x @ w1_t + b1
    mf = hf.mean(0, keepdims=True)
    vf = ((hf - mf) ** 2).mean(0, keepdims=True)
    hnf = jnp.maximum((hf - mf) / jnp.sqrt(vf + EPS) * gamma + beta, 0.0)
    ref_f32 = hnf @ w2_t + b2
    assert jnp.allclose(out, ref_f32, atol=5e-2, rtol=5e-2), "mismatch vs f32 reference"

    print("KERNEL_OK")
</pallas_src>

<mosaic_0001>
module attributes {stable_mosaic.version = 11 : i64} {
  func.func @mlp_kernel(%arg0: i32, %arg1: i32, %arg2: memref<128x256xbf16, #tpu.memory_space<vmem>>, %arg3: memref<1x256x256xbf16, #tpu.memory_space<vmem>>, %arg4: memref<1x256xf32, #tpu.memory_space<vmem>>, %arg5: memref<1x256xf32, #tpu.memory_space<vmem>>, %arg6: memref<256x128xbf16, #tpu.memory_space<vmem>>, %arg7: memref<1x128x128xf32, #tpu.memory_space<vmem>>) attributes {dimension_semantics = [#tpu.dimension_semantics<parallel>, #tpu.dimension_semantics<arbitrary>], iteration_bounds = array<i64: 1, 2>, scalar_prefetch = 0 : i64, scratch_operands = 0 : i64, tpu.core_type = #tpu.core_type<tc>, window_params = [{pipeline_mode = #tpu.pipeline_mode<synchronous>, transform_indices = @transform_0, window_bounds = array<i64: 128, 256>}, {transform_indices = @transform_1, window_bounds = array<i64: 1, 256, 256>}, {transform_indices = @transform_2, window_bounds = array<i64: 1, 256>}, {transform_indices = @transform_3, window_bounds = array<i64: 1, 256>}, {transform_indices = @transform_4, window_bounds = array<i64: 256, 128>}, {pipeline_mode = #tpu.pipeline_mode<synchronous>, transform_indices = @transform_5, window_bounds = array<i64: 1, 128, 128>}]} {
    %c0_i32 = arith.constant 0 : i32
    %0 = arith.cmpi eq, %arg1, %c0_i32 : i32
    %1 = arith.extui %0 : i1 to i32
    %c0_i32_0 = arith.constant 0 : i32
    %2 = arith.cmpi ne, %1, %c0_i32_0 : i32
    scf.if %2 {
      %cst_24 = arith.constant 0.000000e+00 : f32
      %39 = vector.broadcast %cst_24 : f32 to vector<128x128xf32>
      %c0_25 = arith.constant 0 : index
      %c0_26 = arith.constant 0 : index
      %c0_27 = arith.constant 0 : index
      %40 = vector.load %arg7[%c0_25, %c0_26, %c0_27] : memref<1x128x128xf32, #tpu.memory_space<vmem>>, vector<1x128x128xf32>
      %41 = vector.shape_cast %40 : vector<1x128x128xf32> to vector<128x128xf32>
      %42 = vector.shape_cast %39 : vector<128x128xf32> to vector<1x128x128xf32>
      tpu.vector_store %arg7[%c0_25, %c0_26, %c0_27], %42 {strides = array<i32>} : memref<1x128x128xf32, #tpu.memory_space<vmem>>, vector<1x128x128xf32>,
    } else {
    }
    %c0 = arith.constant 0 : index
    %c0_1 = arith.constant 0 : index
    %3 = vector.load %arg2[%c0, %c0_1] : memref<128x256xbf16, #tpu.memory_space<vmem>>, vector<128x256xbf16>
    %c0_2 = arith.constant 0 : index
    %c0_3 = arith.constant 0 : index
    %c0_4 = arith.constant 0 : index
    %4 = vector.load %arg3[%c0_2, %c0_3, %c0_4] : memref<1x256x256xbf16, #tpu.memory_space<vmem>>, vector<1x256x256xbf16>
    %5 = vector.shape_cast %4 : vector<1x256x256xbf16> to vector<256x256xbf16>
    %cst = arith.constant dense<0.000000e+00> : vector<128x256xf32>
    %6 = tpu.matmul %3, %5, %cst {dimension_numbers = #tpu.dot_dimension_numbers<[1], [0], [0], [1], [0, 0, 1, 1], [], []>} : vector<128x256xbf16>, vector<256x256xbf16>, vector<128x256xf32> -> vector<128x256xf32>
    %cst_5 = arith.constant dense<0.000000e+00> : vector<256xf32>
    %7 = vector.multi_reduction <add>, %6, %cst_5 [0] : vector<128x256xf32> to vector<256xf32>
    %8 = vector.shape_cast %7 : vector<256xf32> to vector<1x256xf32>
    %cst_6 = arith.constant 1.280000e+02 : f32
    %9 = vector.broadcast %cst_6 : f32 to vector<1x256xf32>
    %10 = arith.divf %8, %9 : vector<1x256xf32>
    %11 = vector.broadcast %10 : vector<1x256xf32> to vector<128x256xf32>
    %12 = arith.subf %6, %11 : vector<128x256xf32>
    %13 = arith.mulf %12, %12 : vector<128x256xf32>
    %cst_7 = arith.constant dense<0.000000e+00> : vector<256xf32>
    %14 = vector.multi_reduction <add>, %13, %cst_7 [0] : vector<128x256xf32> to vector<256xf32>
    %15 = vector.shape_cast %14 : vector<256xf32> to vector<1x256xf32>
    %cst_8 = arith.constant 1.280000e+02 : f32
    %16 = vector.broadcast %cst_8 : f32 to vector<1x256xf32>
    %17 = arith.divf %15, %16 : vector<1x256xf32>
    %c0_9 = arith.constant 0 : index
    %c0_10 = arith.constant 0 : index
    %18 = vector.load %arg4[%c0_9, %c0_10] : memref<1x256xf32, #tpu.memory_space<vmem>>, vector<1x256xf32>
    %cst_11 = arith.constant 9.99999974E-6 : f32
    %19 = vector.broadcast %cst_11 : f32 to vector<1x256xf32>
    %20 = arith.addf %17, %19 : vector<1x256xf32>
    %21 = math.rsqrt %20 : vector<1x256xf32>
    %22 = arith.mulf %18, %21 : vector<1x256xf32>
    %23 = vector.broadcast %22 : vector<1x256xf32> to vector<128x256xf32>
    %24 = arith.mulf %12, %23 : vector<128x256xf32>
    %c0_12 = arith.constant 0 : index
    %c0_13 = arith.constant 0 : index
    %25 = vector.load %arg5[%c0_12, %c0_13] : memref<1x256xf32, #tpu.memory_space<vmem>>, vector<1x256xf32>
    %26 = vector.broadcast %25 : vector<1x256xf32> to vector<128x256xf32>
    %27 = arith.addf %24, %26 : vector<128x256xf32>
    %cst_14 = arith.constant 0.000000e+00 : f32
    %28 = vector.broadcast %cst_14 : f32 to vector<128x256xf32>
    %29 = arith.maximumf %27, %28 : vector<128x256xf32>
    %c0_15 = arith.constant 0 : index
    %c0_16 = arith.constant 0 : index
    %c0_17 = arith.constant 0 : index
    %30 = vector.load %arg7[%c0_15, %c0_16, %c0_17] : memref<1x128x128xf32, #tpu.memory_space<vmem>>, vector<1x128x128xf32>
    %31 = vector.shape_cast %30 : vector<1x128x128xf32> to vector<128x128xf32>
    %32 = arith.truncf %29 : vector<128x256xf32> to vector<128x256xbf16>
    %c0_18 = arith.constant 0 : index
    %c0_19 = arith.constant 0 : index
    %33 = vector.load %arg6[%c0_18, %c0_19] : memref<256x128xbf16, #tpu.memory_space<vmem>>, vector<256x128xbf16>
    %cst_20 = arith.constant dense<0.000000e+00> : vector<128x128xf32>
    %34 = tpu.matmul %32, %33, %cst_20 {dimension_numbers = #tpu.dot_dimension_numbers<[1], [0], [0], [1], [0, 0, 1, 1], [], []>} : vector<128x256xbf16>, vector<256x128xbf16>, vector<128x128xf32> -> vector<128x128xf32>
    %35 = arith.addf %31, %34 : vector<128x128xf32>
    %c0_21 = arith.constant 0 : index
    %c0_22 = arith.constant 0 : index
    %c0_23 = arith.constant 0 : index
    %36 = vector.load %arg7[%c0_21, %c0_22, %c0_23] : memref<1x128x128xf32, #tpu.memory_space<vmem>>, vector<1x128x128xf32>
    %37 = vector.shape_cast %36 : vector<1x128x128xf32> to vector<128x128xf32>
    %38 = vector.shape_cast %35 : vector<128x128xf32> to vector<1x128x128xf32>
    tpu.vector_store %arg7[%c0_21, %c0_22, %c0_23], %38 {strides = array<i32>} : memref<1x128x128xf32, #tpu.memory_space<vmem>>, vector<1x128x128xf32>,
    return
  }
  func.func @transform_0(%arg0: i32, %arg1: i32) -> (i32, i32) {
    %c0_i32 = arith.constant 0 : i32
    %c0_i32_0 = arith.constant 0 : i32
    %c0_i32_1 = arith.constant 0 : i32
    return %c0_i32, %c0_i32_0 : i32, i32
  }
  func.func @transform_1(%arg0: i32, %arg1: i32) -> (i32, i32, i32) {
    %c2_i32 = arith.constant 2 : i32
    %0 = arith.muli %arg0, %c2_i32 : i32
    %1 = arith.addi %0, %arg1 : i32
    %c0_i32 = arith.constant 0 : i32
    %c0_i32_0 = arith.constant 0 : i32
    %c0_i32_1 = arith.constant 0 : i32
    return %1, %c0_i32, %c0_i32_0 : i32, i32, i32
  }
  func.func @transform_2(%arg0: i32, %arg1: i32) -> (i32, i32) {
    %c2_i32 = arith.constant 2 : i32
    %0 = arith.muli %arg0, %c2_i32 : i32
    %1 = arith.addi %0, %arg1 : i32
    %c0_i32 = arith.constant 0 : i32
    %c0_i32_0 = arith.constant 0 : i32
    return %c0_i32, %1 : i32, i32
  }
  func.func @transform_3(%arg0: i32, %arg1: i32) -> (i32, i32) {
    %c2_i32 = arith.constant 2 : i32
    %0 = arith.muli %arg0, %c2_i32 : i32
    %1 = arith.addi %0, %arg1 : i32
    %c0_i32 = arith.constant 0 : i32
    %c0_i32_0 = arith.constant 0 : i32
    return %c0_i32, %1 : i32, i32
  }
  func.func @transform_4(%arg0: i32, %arg1: i32) -> (i32, i32) {
    %c2_i32 = arith.constant 2 : i32
    %0 = arith.muli %arg0, %c2_i32 : i32
    %1 = arith.addi %0, %arg1 : i32
    %c0_i32 = arith.constant 0 : i32
    %c0_i32_0 = arith.constant 0 : i32
    return %1, %c0_i32 : i32, i32
  }
  func.func @transform_5(%arg0: i32, %arg1: i32) -> (i32, i32, i32) {
    %c0_i32 = arith.constant 0 : i32
    %c0_i32_0 = arith.constant 0 : i32
    %c0_i32_1 = arith.constant 0 : i32
    return %arg0, %c0_i32, %c0_i32_0 : i32, i32, i32
  }
}

</mosaic_0001>

<bundles_post_ra>
// kernel: tpu_custom_call.1
= control target key start
LH: loop header
LB: loop body
LE: loop exit
PB: predicated region body
PF: predicated region fallthrough
CT: control target
= control target key end

     0   :  { %s2772_s0 = inlined_call_operand.hbm [shape: bf16[128,256], index: 0, kind: input, shape index: {}]   ;;  %s2773_s1 = inlined_call_operand.hbm [shape: bf16[2,256,256], index: 1, kind: input, shape index: {}]   ;;  %s2774_s2 = inlined_call_operand.hbm [shape: f32[1,512], index: 2, kind: input, shape index: {}]   ;;  %s2775_s3 = inlined_call_operand.vmem [shape: f32[1,512], index: 3, kind: input, shape index: {}]   ;;  %s2776_s4 = inlined_call_operand.hbm [shape: bf16[512,128], index: 4, kind: input, shape index: {}]   ;;  %s2777_s5 = inlined_call_operand.hbm [shape: f32[1,128,128], index: 5, kind: output, shape index: {}]  }
   0x1   :  { %2779 = sst [smem:[#allocation15_spill]] %s2772_s0 }
   0x2   :  { %10 = vsyncpa [#allocation3], 0 }
   0x3   :  { %11 = vsyncpa [#allocation6], 0 }
   0x4   :  { %13 = vsyncpa [#allocation6 + $0x1], 0 }
   0x5   :  { %14 = vsyncpa [#allocation9], 0 }
   0x6   :  { %16 = vsyncpa [#allocation9 + $0x1], 0 }
   0x7   :  { %17 = vsyncpa [#allocation4], 0  ;;  %s2126_s18 = smov 0   ;;  %s2128_s19 = smov 0  }
   0x8   :  { %s2130_s20 = smov 0   ;;  %s2132_s21 = smov 0  }
   0x9   :  { %s2134_s22 = smov 0   ;;  %s2136_s23 = smov 0  }
   0xa LB: > { %s32_s24 = sadd.s32 1, %s2077_s22  ;;  %s67_s25 = sadd.s32 1, %s2069_s20  ;;  %s2081_s23 = sphi %s2136_s23, %s23_s23   ;;  %s2077_s22 = sphi %s2134_s22, %s2792_s22   ;;  %s2073_s21 = sphi %s2132_s21, %s2791_s21   ;;  %s2069_s20 = sphi %s2130_s20, %s2790_s20   ;;  %s2065_s19 = sphi %s2128_s19, %s2789_s19   ;;  %s2061_s18 = sphi %s2126_s18, %s2788_s18  }
   0xb   : > { %p33_p0 = scmp.ge.s32.totalorder %s32_s24, 2  ;;  %p74_p1 = scmp.ne.s32.totalorder %s2069_s20, %s2065_s19 }
   0xc   : > { %p75_p2 = scmp.eq.s32.totalorder %s2081_s23, 0  ;;  %p1731_p5 = scmp.lt.s32.totalorder %s2081_s23, 2 }
   0xd   : > { %s2794_s24 = smov (%p33_p0, %s32_s24), 0  ;;  %s233_s28 = sand.u32 1, %s2081_s23  }
   0xe   : > { %p2163_p3 = por %p75_p2, %p74_p1  ;;  %s64_s27 = ssub.s32 %s2077_s22, %s2794_s24 }
   0xf   : > { %p65_p4 = scmp.eq.s32.totalorder %s64_s27, 0  ;;  %s2172_s29 = sand.u32 1, %s2069_s20  }
  0x10   : > { %s1551_s6 = sshll.u32 %s2172_s29, 8  ;;  %s1635_s7 = sshll.u32 %s2077_s22, 12 }
  0x11   : > { %s2175_s30 = scalar_select %p65_p4, %s2069_s20, %s67_s25  }
  0x12   : > { %s245_s10 = scalar_lea.hbm %s2773_s1, %s1635_s7  ;;  %s237_s11 = scalar_lea.vmem [#allocation5], %s1551_s6 }
  0x13   : > { %s246_s12 = sshll.u32 %s237_s11, 4  ;;  %p2184_p6 = pnand %p1731_p5, %p2163_p3  ;;  %s247_s12 = int_to_ptr.vmem [resolvable:$true] %s246_s12 }
  0x14   : > { %s2188_s14 = scalar_lea.sflag [#allocation6], %s233_s28  ;;  %s1898_s15 = scalar_lea.vmem %s247_s12, 4096 }
  0x15   : > { %p1887_p7 = pneg %p2184_p6  ;;  %p1899_p8 = scmp.ne.s32.totalorder %s247_s12, %s1898_s15 }
  0x16   : > { %s2083_s16 = smov [#allocation5]  }
  0x17   : > { %p1901_p9 = pnand %p1899_p8, %p1887_p7  ;;  %s1903_s17 = sshll.u32 %s2083_s16, 4  ;;  %s1904_s17 = int_to_ptr.vmem [resolvable:$false] %s1903_s17 }
  0x18   : > { %s1905_s25 = scalar_lea.vmem %s1904_s17, 8192  ;;  %p1906_p11 = scmp.lt.s32.totalorder %s247_s12, %s1904_s17 }
  0x19   : > { %p1902_p10 = pneg %p1901_p9  ;;  %p1907_p12 = scmp.lt.s32.totalorder %s1905_s25, %s1898_s15 }
  0x1b   : > { %p1908_p13 = por %p1907_p12, %p1906_p11 }
  0x1d   : > { %p1909_p0 = pnand %p1908_p13, %p1902_p10 }
  0x1f   : > { %1912 = shalt.err (!%p1909_p0)
}
  0x20   : > { %s2084_s26 = smov 128   ;;  %s2085_s27 = smov 8  }
  0x21   : > { %1723 = dma.hbm_to_vmem [thread:$0]  (!%p2184_p6), %s245_s10, 4096, %s247_s12, %s2188_s14, %s2084_s26, %s2084_s26, %s2085_s27  }
  0x22   : > { %s2202_s28 = sadd.s32 4294967295, %s2081_s23   ;;  %p80_p1 = scmp.ne.s32.totalorder %s2065_s19, %s2061_s18 }
  0x23   : > { %p2778_p2 = scmp.eq.s32.totalorder %s2202_s28, 0  ;;  %p1548_p3 = scmp.ge.s32.totalorder %s2081_s23, 1 }
  0x24   : > { %p207_p4 = scmp.lt.s32.totalorder %s2081_s23, 3  ;;  %s2086_s8 = smov [#allocation2]  }
  0x25   : > { %p2211_p5 = por %p2778_p2, %p80_p1  ;;  %s219_s9 = sshll.u32 %s2086_s8, 4  ;;  %s220_s9 = int_to_ptr.vmem [resolvable:$true] %s219_s9 }
  0x26   : > { %p2215_p8 = pnand %p1548_p3, %p207_p4  ;;  %s1554_s10 = sshll.u32 %s2172_s29, 1 }
  0x27   : > { %s1636_s18 = sshll.u32 %s2077_s22, 5  ;;  %s260_s17 = scalar_lea.vmem [#allocation7], %s1554_s10 }
  0x28   : > { %p1716_p9 = pneg %p2215_p8  ;;  %s2232_s16 = scalar_lea.hbm %s2774_s2, %s1636_s18 }
  0x29   : > { %s270_s25 = sshll.u32 %s260_s17, 4  ;;  %s1924_s8 = scalar_lea.vmem %s220_s9, 2048  ;;  %s271_s25 = int_to_ptr.vmem [resolvable:$true] %s270_s25 }
  0x2a   : > { %p2225_p10 = pnand %p1716_p9, %p2778_p2  ;;  %p1925_p12 = scmp.ne.s32.totalorder %s220_s9, %s1924_s8 }
  0x2b   : > { %p1932_p1 = scmp.lt.s32.totalorder %s220_s9, %s220_s9  ;;  %p1933_p3 = scmp.lt.s32.totalorder %s1924_s8, %s1924_s8 }
  0x2c   : > { %p1915_p11 = pneg %p2225_p10 }
  0x2d   : > { %p1934_p4 = por %p1933_p3, %p1932_p1 }
  0x2e   : > { %p1927_p13 = pnand %p1925_p12, %p1915_p11 }
  0x30   : > { %p1928_p0 = pneg %p1927_p13 }
  0x32   : > { %p1935_p9 = pnand %p1934_p4, %p1928_p0 }
  0x34   : > { %1938 = shalt.err (!%p1935_p9)
}
  0x35   : > { %s2785_s0 = sld [smem:[#allocation15_spill]]  ;;  %s1952_s12 = scalar_lea.vmem %s271_s25, 32 }
  0x36   : > { %p1953_p2 = scmp.ne.s32.totalorder %s271_s25, %s1952_s12  ;;  %s2087_s15 = smov [#allocation7]  }
  0x37   : > { %s1957_s17 = sshll.u32 %s2087_s15, 4  ;;  %s1958_s17 = int_to_ptr.vmem [resolvable:$false] %s1957_s17 }
  0x38   : > { %p1955_p11 = pnand %p1953_p2, %p1887_p7  ;;  %s1959_s8 = scalar_lea.vmem %s1958_s17, 64 }
  0x39   : > { %p1960_p13 = scmp.lt.s32.totalorder %s271_s25, %s1958_s17  ;;  %p1961_p0 = scmp.lt.s32.totalorder %s1959_s8, %s1952_s12 }
  0x3a   : > { %p1956_p12 = pneg %p1955_p11 }
  0x3b   : > { %1719 = dma.hbm_to_vmem [thread:$0]  (!%p2225_p10), %s2785_s0, 2048, %s220_s9, [#allocation3], %s2084_s26, %s2084_s26, %s2085_s27  }
  0x3c   : > { %p1962_p1 = por %p1961_p0, %p1960_p13 }
  0x3e   : > { %p1963_p3 = pnand %p1962_p1, %p1956_p12 }
  0x40   : > { %1966 = shalt.err (!%p1963_p3)
}
  0x41   : > { %1726 = dma.hbm_to_vmem [thread:$0]  (!%p2184_p6), %s2232_s16, 32, %s271_s25, %s2188_s14  }
  0x42   : > { %s1557_s26 = sshll.u32 %s2172_s29, 7  ;;  %s1637_s27 = sshll.u32 %s2077_s22, 11 }
  0x43   : > { %s301_s18 = scalar_lea.hbm %s2776_s4, %s1637_s27  ;;  %s293_s10 = scalar_lea.vmem [#allocation8], %s1557_s26 }
  0x44   : > { %s302_s12 = sshll.u32 %s293_s10, 4  ;;  %s290_s15 = scalar_lea.sflag [#allocation9], %s2172_s29  ;;  %s303_s12 = int_to_ptr.vmem [resolvable:$true] %s302_s12 }
  0x45   : > { %s1980_s17 = scalar_lea.vmem %s303_s12, 2048  ;;  %s2088_s8 = smov [#allocation8]  }
  0x46   : > { %p1981_p2 = scmp.ne.s32.totalorder %s303_s12, %s1980_s17  ;;  %s1985_s0 = sshll.u32 %s2088_s8, 4  ;;  %s1986_s0 = int_to_ptr.vmem [resolvable:$false] %s1985_s0 }
  0x47   : > { %s1987_s14 = scalar_lea.vmem %s1986_s0, 4096  ;;  %p1988_p9 = scmp.lt.s32.totalorder %s303_s12, %s1986_s0 }
  0x48   : > { %p1983_p10 = pnand %p1981_p2, %p1887_p7  ;;  %p1989_p11 = scmp.lt.s32.totalorder %s1987_s14, %s1980_s17 }
  0x4a   : > { %p1984_p4 = pneg %p1983_p10  ;;  %p1990_p12 = por %p1989_p11, %p1988_p9 }
  0x4c   : > { %p1991_p13 = pnand %p1990_p12, %p1984_p4 }
  0x4e   : > { %1994 = shalt.err (!%p1991_p13)
}
  0x4f   : > { %s2089_s16 = smov 64   ;;  %s2090_s25 = smov 4  }
  0x50   : > { %1729 = dma.hbm_to_vmem [thread:$0]  (!%p2184_p6), %s301_s18, 2048, %s303_s12, %s290_s15, %s2089_s16, %s2089_s16, %s2090_s25  }
  0x51   : > { %314 = sbr.rel (%p2215_p8) target bundleno = 796 (0x31c), region = 40  ;;  %p2786_p7 = scmp.eq.s32.totalorder (!%p2215_p8), %s2202_s28, 0 }
  0x56   : > { %2044 = dma.done.wait (%p2786_p7), [#allocation3], 2048   ;;  %p2787_p0 = pmov %p2786_p7 }
  0x57   : > { %s320_s0 = sand.u32 1, %s2202_s28   ;;  %s322_s29 = sand.u32 1, %s2065_s19  }
  0x58   : > { %2046 = vsyncadd (%p2787_p0), [#allocation3], 4294965248  ;;  %s1562_s26 = sshll.u32 %s322_s29, 8  ;;  %s321_s27 = scalar_lea.sflag [#allocation6], %s320_s0 }
  0x59   : > { %s2270_s9 = scalar_lea.vmem [#allocation5], %s1562_s26 }
  0x5a   : > { %2048 = dma.done.wait (%p2211_p5), %s321_s27, 4128  }
  0x5b   : > { %2050 = vsyncadd (%p2211_p5), %s321_s27, 4294963168  ;;  %s1563_s13 = sshll.u32 %s322_s29, 1  ;;  %s1564_s7 = sshll.u32 %s322_s29, 7 }
  0x5c   : > { %s2276_s11 = scalar_lea.vmem [#allocation7], %s1563_s13  ;;  %s339_s18 = scalar_lea.sflag [#allocation9], %s322_s29 }
  0x5d   : > { %s2278_s10 = scalar_lea.vmem [#allocation8], %s1564_s7 }
  0x5e   : > { %2052 = dma.done.wait (%p2211_p5), %s339_s18, 2048  }
  0x5f   : > { %2054 = vsyncadd (%p2211_p5), %s339_s18, 4294965248  ;;  %s1565_s12 = sshll.u32 %s2073_s21, 1  ;;  %p1566_p8 = scmp.ne.s32.totalorder %s2073_s21, 0 }
  0x60   : > { %p388_p6 = scmp.lt.s32.totalorder %s1565_s12, 3 }
  0x61   : > { %401 = sbr.rel (%p1566_p8) target bundleno = 111 (0x6f), region = 60 }
  0x62   : > { %s2796_s12 = smov (!%p388_p6, %s1565_s12), 3 }
  0x63   : > { %s390_s8 = scalar_lea.vmem %s2775_s3, %s2796_s12 }
  0x66   : > { %v2091_v0 = vmov 0.0  }
  0x67   : > { %402 = vst [vmem:[#allocation10] sm:$0xff] %v2091_v0  ;;  %403 = vst [vmem:[#allocation10 + $0x8] sm:$0xff] %v2091_v0 }
  0x68   : > { %404 = vst [vmem:[#allocation10 + $0x10] sm:$0xff] %v2091_v0  ;;  %405 = vst [vmem:[#allocation10 + $0x18] sm:$0xff] %v2091_v0 }
  0x69   : > { %406 = vst [vmem:[#allocation10 + $0x20] sm:$0xff] %v2091_v0  ;;  %407 = vst [vmem:[#allocation10 + $0x28] sm:$0xff] %v2091_v0 }
  0x6a   : > { %408 = vst [vmem:[#allocation10 + $0x30] sm:$0xff] %v2091_v0  ;;  %409 = vst [vmem:[#allocation10 + $0x38] sm:$0xff] %v2091_v0 }
  0x6b   : > { %410 = vst [vmem:[#allocation10 + $0x40] sm:$0xff] %v2091_v0  ;;  %411 = vst [vmem:[#allocation10 + $0x48] sm:$0xff] %v2091_v0 }
  0x6c   : > { %412 = vst [vmem:[#allocation10 + $0x50] sm:$0xff] %v2091_v0  ;;  %413 = vst [vmem:[#allocation10 + $0x58] sm:$0xff] %v2091_v0 }
  0x6d   : > { %414 = vst [vmem:[#allocation10 + $0x60] sm:$0xff] %v2091_v0  ;;  %415 = vst [vmem:[#allocation10 + $0x68] sm:$0xff] %v2091_v0 }
  0x6e   : > { %416 = vst [vmem:[#allocation10 + $0x70] sm:$0xff] %v2091_v0  ;;  %417 = vst [vmem:[#allocation10 + $0x78] sm:$0xff] %v2091_v0 }
  0x6f PF: > { %v1793_v1 = vld [vmem:[%s2270_s9 + $0x74] ss:$8 sps:$4 sm:$0xff]   ;;  %v1795_v2 = vld [vmem:[%s2270_s9 + $0x70] ss:$8 sps:$4 sm:$0xff]   ;;  %v1796_v3 = vld [vmem:[%s2270_s9 + $0x64] ss:$8 sps:$4 sm:$0xff]  }
  0x70   : > { %706 = vmatprep.subr.bf16.mxu0 %v1793_v1  ;;  %v1798_v4 = vld [vmem:[%s2270_s9 + $0x60] ss:$8 sps:$4 sm:$0xff]   ;;  %v1799_v5 = vld [vmem:[%s2270_s9 + $0x54] ss:$8 sps:$4 sm:$0xff]   ;;  %v1801_v6 = vld [vmem:[%s2270_s9 + $0x50] ss:$8 sps:$4 sm:$0xff]  }
  0x71   : > { %707 = vmatpush1.bf16.msra.mxu0 %v1795_v2  ;;  %v1802_v7 = vld [vmem:[%s2270_s9 + $0x44] ss:$8 sps:$4 sm:$0xff]   ;;  %v1804_v8 = vld [vmem:[%s2270_s9 + $0x40] ss:$8 sps:$4 sm:$0xff]   ;;  %v1805_v9 = vld [vmem:[%s2270_s9 + $0x34] ss:$8 sps:$4 sm:$0xff]  }
  0x72   : > { %708 = vmatprep.subr.bf16.mxu0 %v1796_v3  ;;  %v1807_v10 = vld [vmem:[%s2270_s9 + $0x30] ss:$8 sps:$4 sm:$0xff]   ;;  %v1808_v11 = vld [vmem:[%s2270_s9 + $0x24] ss:$8 sps:$4 sm:$0xff]   ;;  %v1810_v12 = vld [vmem:[%s2270_s9 + $0x20] ss:$8 sps:$4 sm:$0xff]  }
  0x73   : > { %v1811_v13 = vld [vmem:[%s2270_s9 + $0x14] ss:$8 sps:$4 sm:$0xff]   ;;  %v1843_v14 = vld [vmem:[#allocation2 + $0x4] ss:$8 sps:$4 sm:$0xff]   ;;  %v1813_v15 = vld [vmem:[%s2270_s9 + $0x10] ss:$8 sps:$4 sm:$0xff]  }
  0x74   : > { %v1814_v16 = vld [vmem:[%s2270_s9 + $0x4] ss:$8 sps:$4 sm:$0xff]   ;;  %738 = vmatprep.mubr.bf16.mxu0 %v1843_v14  ;;  %v1816_v17 = vld [vmem:[%s2270_s9] ss:$8 sps:$4 sm:$0xff]   ;;  %v1817_v18 = vld [vmem:[%s2270_s9 + $0xf4] ss:$8 sps:$4 sm:$0xff]  }
  0x75   : > { %709 = vmatpush1.bf16.msra.mxu0 %v1798_v4  ;;  %v1819_v19 = vld [vmem:[%s2270_s9 + $0xf0] ss:$8 sps:$4 sm:$0xff]   ;;  %v1820_v20 = vld [vmem:[%s2270_s9 + $0xe4] ss:$8 sps:$4 sm:$0xff]   ;;  %v1822_v21 = vld [vmem:[%s2270_s9 + $0xe0] ss:$8 sps:$4 sm:$0xff]  }
  0x76   : > { %710 = vmatprep.subr.bf16.mxu0 %v1799_v5  ;;  %v1823_v22 = vld [vmem:[%s2270_s9 + $0xd4] ss:$8 sps:$4 sm:$0xff]   ;;  %v1825_v23 = vld [vmem:[%s2270_s9 + $0xd0] ss:$8 sps:$4 sm:$0xff]   ;;  %v1826_v24 = vld [vmem:[%s2270_s9 + $0xc4] ss:$8 sps:$4 sm:$0xff]  }
  0x77   : > { %v1828_v25 = vld [vmem:[%s2270_s9 + $0xc0] ss:$8 sps:$4 sm:$0xff]   ;;  %v1829_v26 = vld [vmem:[%s2270_s9 + $0xb4] ss:$8 sps:$4 sm:$0xff]   ;;  %v1831_v27 = vld [vmem:[%s2270_s9 + $0xb0] ss:$8 sps:$4 sm:$0xff]  }
  0x78   : > { %v1832_v28 = vld [vmem:[%s2270_s9 + $0xa4] ss:$8 sps:$4 sm:$0xff]   ;;  %v1834_v29 = vld [vmem:[%s2270_s9 + $0xa0] ss:$8 sps:$4 sm:$0xff]   ;;  %v1835_v30 = vld [vmem:[%s2270_s9 + $0x94] ss:$8 sps:$4 sm:$0xff]  }
  0x79   : > { %711 = vmatpush1.bf16.msra.mxu0 %v1801_v6  ;;  %v1837_v31 = vld [vmem:[%s2270_s9 + $0x90] ss:$8 sps:$4 sm:$0xff]   ;;  %v1838_v32 = vld [vmem:[%s2270_s9 + $0x84] ss:$8 sps:$4 sm:$0xff]   ;;  %v1840_v33 = vld [vmem:[%s2270_s9 + $0x80] ss:$8 sps:$4 sm:$0xff]  }
  0x7a   : > { %712 = vmatprep.subr.bf16.mxu0 %v1802_v7  ;;  %v1841_v34 = vld [vmem:[#allocation2] ss:$8 sps:$4 sm:$0xff]   ;;  %v1844_v35 = vld [vmem:[#allocation2 + $0x14] ss:$8 sps:$4 sm:$0xff]   ;;  %v1846_v36 = vld [vmem:[#allocation2 + $0x10] ss:$8 sps:$4 sm:$0xff]  }
  0x7b   : > { %v1847_v37 = vld [vmem:[#allocation2 + $0x24] ss:$8 sps:$4 sm:$0xff]   ;;  %v1849_v38 = vld [vmem:[#allocation2 + $0x20] ss:$8 sps:$4 sm:$0xff]   ;;  %v1850_v39 = vld [vmem:[#allocation2 + $0x34] ss:$8 sps:$4 sm:$0xff]  }
  0x7c   : > { %v1852_v40 = vld [vmem:[#allocation2 + $0x30] ss:$8 sps:$4 sm:$0xff]   ;;  %v1853_v41 = vld [vmem:[#allocation2 + $0x44] ss:$8 sps:$4 sm:$0xff]   ;;  %v1855_v42 = vld [vmem:[#allocation2 + $0x40] ss:$8 sps:$4 sm:$0xff]  }
  0x7d   : > { %713 = vmatpush1.bf16.msra.mxu0 %v1804_v8  ;;  %v1856_v43 = vld [vmem:[#allocation2 + $0x54] ss:$8 sps:$4 sm:$0xff]   ;;  %v1858_v44 = vld [vmem:[#allocation2 + $0x50] ss:$8 sps:$4 sm:$0xff]   ;;  %v1859_v45 = vld [vmem:[#allocation2 + $0x64] ss:$8 sps:$4 sm:$0xff]  }
  0x7e   : > { %714 = vmatprep.subr.bf16.mxu0 %v1805_v9  ;;  %v1861_v46 = vld [vmem:[#allocation2 + $0x60] ss:$8 sps:$4 sm:$0xff]   ;;  %v1862_v47 = vld [vmem:[#allocation2 + $0x74] ss:$8 sps:$4 sm:$0xff]   ;;  %v1864_v48 = vld [vmem:[#allocation2 + $0x70] ss:$8 sps:$4 sm:$0xff]  }
  0x7f   : > { %v1865_v57 = vld [vmem:[%s2278_s10 + $0x78] sm:$0xff]   ;;  %v1867_v61 = vld [vmem:[%s2278_s10 + $0x70] sm:$0xff]   ;;  %v1869_v1 = vld [vmem:[%s2278_s10 + $0x68] sm:$0xff]   ;;  %s2093_s14 = smov [#allocation10]   ;;  %p1733_p5 = scmp.eq.s32.totalorder %s2202_s28, 1 }
  0x80   : > { %v1866_v59 = vld [vmem:[%s2278_s10 + $0x38] sm:$0xff]   ;;  %1638 = vmatprep.subr.bf16.mxu1 %v1865_v57  ;;  %v1868_v63 = vld [vmem:[%s2278_s10 + $0x30] sm:$0xff]   ;;  %v1870_v3 = vld [vmem:[%s2278_s10 + $0x28] sm:$0xff]   ;;  %s1413_s16 = sshll.u32 %s2093_s14, 4  ;;  %s1414_s16 = int_to_ptr.vmem [resolvable:$true] %s1413_s16 }
  0x81   : > { %715 = vmatpush1.bf16.msra.mxu0 %v1807_v10  ;;  %1639 = vmatpush3.bf16.msra.mxu1 %v1866_v59  ;;  %v1871_v5 = vld [vmem:[%s2278_s10 + $0x60] sm:$0xff]   ;;  %v1873_v9 = vld [vmem:[%s2278_s10 + $0x58] sm:$0xff]   ;;  %s1995_s25 = scalar_lea.vmem %s1414_s16, 2048  ;;  %p2002_p10 = scmp.lt.s32.totalorder %s1414_s16, %s1414_s16 }
  0x82   : > { %716 = vmatprep.subr.bf16.mxu0 %v1808_v11  ;;  %1640 = vmatprep.subr.bf16.mxu1 %v1867_v61  ;;  %v1872_v7 = vld [vmem:[%s2278_s10 + $0x20] sm:$0xff]   ;;  %v1874_v11 = vld [vmem:[%s2278_s10 + $0x18] sm:$0xff]   ;;  %p1996_p1 = scmp.ne.s32.totalorder %s1414_s16, %s1995_s25  ;;  %p2003_p4 = scmp.lt.s32.totalorder %s1995_s25, %s1995_s25 }
  0x84   : > { %p1997_p3 = pnand %p1996_p1, %p1733_p5  ;;  %p2004_p9 = por %p2003_p4, %p2002_p10 }
  0x85   : > { %717 = vmatpush1.bf16.msra.mxu0 %v1810_v12  ;;  %1641 = vmatpush3.bf16.msra.mxu1 %v1868_v63 }
  0x86   : > { %718 = vmatprep.subr.bf16.mxu0 %v1811_v13  ;;  %1642 = vmatprep.subr.bf16.mxu1 %v1869_v1  ;;  %p1998_p2 = pneg %p1997_p3 }
  0x88   : > { %p2005_p11 = pnand %p2004_p9, %p1998_p2 }
  0x89   : > { %719 = vmatpush1.bf16.msra.mxu0 %v1813_v15  ;;  %1643 = vmatpush3.bf16.msra.mxu1 %v1870_v3 }
  0x8a   : > { %720 = vmatprep.subr.bf16.mxu0 %v1814_v16  ;;  %1644 = vmatprep.subr.bf16.mxu1 %v1871_v5  ;;  %v1875_v16 = vld [vmem:[%s2278_s10 + $0x50] sm:$0xff]  }
  0x8d   : > { %721 = vmatpush1.bf16.msra.mxu0 %v1816_v17  ;;  %1645 = vmatpush3.bf16.msra.mxu1 %v1872_v7 }
  0x8e   : > { %722 = vmatprep.subr.bf16.mxu0 %v1817_v18  ;;  %1646 = vmatprep.subr.bf16.mxu1 %v1873_v9  ;;  %v1876_v18 = vld [vmem:[%s2278_s10 + $0x10] sm:$0xff]  }
  0x91   : > { %723 = vmatpush2.bf16.msra.mxu0 %v1819_v19  ;;  %1647 = vmatpush3.bf16.msra.mxu1 %v1874_v11 }
  0x92   : > { %724 = vmatprep.subr.bf16.mxu0 %v1820_v20  ;;  %1648 = vmatprep.subr.bf16.mxu1 %v1875_v16 }
  0x95   : > { %725 = vmatpush2.bf16.msra.mxu0 %v1822_v21  ;;  %1649 = vmatpush3.bf16.msra.mxu1 %v1876_v18 }
  0x96   : > { %726 = vmatprep.subr.bf16.mxu0 %v1823_v22 }
  0x99   : > { %727 = vmatpush2.bf16.msra.mxu0 %v1825_v23 }
  0x9a   : > { %728 = vmatprep.subr.bf16.mxu0 %v1826_v24  ;;  %v1877_v24 = vld [vmem:[%s2278_s10 + $0x48] sm:$0xff]  }
  0x9b   : > { %1650 = vmatprep.subr.bf16.mxu1 %v1877_v24 }
  0x9d   : > { %729 = vmatpush2.bf16.msra.mxu0 %v1828_v25 }
  0x9e   : > { %730 = vmatprep.subr.bf16.mxu0 %v1829_v26  ;;  %v1878_v26 = vld [vmem:[%s2278_s10 + $0x8] sm:$0xff]  }
  0x9f   : > { %1651 = vmatpush3.bf16.msra.mxu1 %v1878_v26 }
  0xa1   : > { %731 = vmatpush2.bf16.msra.mxu0 %v1831_v27 }
  0xa2   : > { %732 = vmatprep.subr.bf16.mxu0 %v1832_v28 }
  0xa5   : > { %733 = vmatpush2.bf16.msra.mxu0 %v1834_v29 }
  0xa6   : > { %734 = vmatprep.subr.bf16.mxu0 %v1835_v30  ;;  %v1879_v30 = vld [vmem:[%s2278_s10 + $0x40] sm:$0xff]  }
  0xa7   : > { %1652 = vmatprep.subr.bf16.mxu1 %v1879_v30 }
  0xa9   : > { %735 = vmatpush2.bf16.msra.mxu0 %v1837_v31  ;;  %v1880_v31 = vld [vmem:[%s2278_s10] sm:$0xff]  }
  0xaa   : > { %736 = vmatprep.subr.bf16.mxu0 %v1838_v32  ;;  %1653 = vmatpush3.bf16.msra.mxu1 %v1880_v31 }
  0xad   : > { %737 = vmatpush2.bf16.msra.mxu0 %v1840_v33 }
  0xb0   : > { %739 = vmatmul.mubr.bf16.vlgmr.msra.gmra.mxu0 %v1841_v34 }
  0xb1   : > { %748 = vmatprep.mubr.bf16.mxu0 %v1844_v35 }
  0xb8   : > { %749 = vmatmul.mubr.bf16.gmra.mxu0 %v1846_v36 }
  0xb9   : > { %758 = vmatprep.mubr.bf16.mxu0 %v1847_v37 }
  0xc0   : > { %759 = vmatmul.mubr.bf16.gmra.mxu0 %v1849_v38 }
  0xc1   : > { %768 = vmatprep.mubr.bf16.mxu0 %v1850_v39 }
  0xc8   : > { %769 = vmatmul.mubr.bf16.gmra.mxu0 %v1852_v40 }
  0xc9   : > { %778 = vmatprep.mubr.bf16.mxu0 %v1853_v41 }
  0xd0   : > { %779 = vmatmul.mubr.bf16.gmra.mxu0 %v1855_v42 }
  0xd1   : > { %788 = vmatprep.mubr.bf16.mxu0 %v1856_v43 }
  0xd8   : > { %789 = vmatmul.mubr.bf16.gmra.mxu0 %v1858_v44 }
  0xd9   : > { %798 = vmatprep.mubr.bf16.mxu0 %v1859_v45 }
  0xe0   : > { %799 = vmatmul.mubr.bf16.gmra.mxu0 %v1861_v46 }
  0xe1   : > { %808 = vmatprep.mubr.bf16.mxu0 %v1862_v47 }
  0xe8   : > { %809 = vmatmul.mubr.bf16.gmra.mxu0 %v1864_v48 }
 0x170   : > { %v2324_v49 = vpop.f32.mrf.mxu0 }
 0x172   : > { %v2326_v50 = vpop.f32.mrf.mxu0 }
 0x174   : > { %v2328_v51 = vpop.f32.mrf.mxu0 }
 0x175   : > { %v819_v12 = vadd.f32 %v2328_v51, %v2324_v49 }
 0x176   : > { %v2330_v52 = vpop.f32.mrf.mxu0 }
 0x177   : > { %v840_v14 = vadd.f32 %v2330_v52, %v2326_v50 }
 0x178   : > { %v2332_v53 = vpop.f32.mrf.mxu0 }
 0x179   : > { %v820_v15 = vadd.f32 %v819_v12, %v2332_v53 }
 0x17a   : > { %v2334_v54 = vpop.f32.mrf.mxu0 }
 0x17b   : > { %v841_v19 = vadd.f32 %v840_v14, %v2334_v54 }
 0x17c   : > { %v2336_v55 = vpop.f32.mrf.mxu0 }
 0x17d   : > { %v821_v20 = vadd.f32 %v820_v15, %v2336_v55 }
 0x17e   : > { %v2338_v56 = vpop.f32.mrf.mxu0 }
 0x17f   : > { %v842_v22 = vadd.f32 %v841_v19, %v2338_v56 }
 0x180   : > { %v2341_v58 = vpop.f32.mrf.mxu0 }
 0x181   : > { %v822_v23 = vadd.f32 %v821_v20, %v2341_v58 }
 0x182   : > { %v2344_v60 = vpop.f32.mrf.mxu0 }
 0x183   : > { %v843_v27 = vadd.f32 %v842_v22, %v2344_v60 }
 0x184   : > { %v2347_v62 = vpop.f32.mrf.mxu0 }
 0x185   : > { %v823_v28 = vadd.f32 %v822_v23, %v2347_v62 }
 0x186   : > { %v2350_v0 = vpop.f32.mrf.mxu0 }
 0x187   : > { %v844_v32 = vadd.f32 %v843_v27, %v2350_v0 }
 0x188   : > { %v2353_v2 = vpop.f32.mrf.mxu0 }
 0x189   : > { %v824_v33 = vadd.f32 %v823_v28, %v2353_v2 }
 0x18a   : > { %v2356_v4 = vpop.f32.mrf.mxu0 }
 0x18b   : > { %v845_v35 = vadd.f32 %v844_v32, %v2356_v4 }
 0x18c   : > { %v2359_v6 = vpop.f32.mrf.mxu0 }
 0x18d   : > { %v825_v36 = vadd.f32 %v824_v33, %v2359_v6 }
 0x18e   : > { %v2362_v8 = vpop.f32.mrf.mxu0 }
 0x18f   : > { %v846_v38 = vadd.f32 %v845_v35, %v2362_v8 }
 0x190   : > { %v2365_v10 = vpop.f32.mrf.mxu0 }
 0x191   : > { %v826_v39 = vadd.f32 %v825_v36, %v2365_v10 }
 0x192   : > { %v2370_v13 = vpop.f32.mrf.mxu0 }
 0x193   : > { %v847_v41 = vadd.f32 %v846_v38, %v2370_v13 }
 0x194   : > { %v2376_v17 = vpop.f32.mrf.mxu0 }
 0x195   : > { %v827_v42 = vadd.f32 %v826_v39, %v2376_v17 }
 0x196   : > { %v2381_v21 = vpop.f32.mrf.mxu0 }
 0x197   : > { %v848_v44 = vadd.f32 %v847_v41, %v2381_v21 }
 0x198   : > { %v2386_v25 = vpop.f32.mrf.mxu0 }
 0x199   : > { %v828_v45 = vadd.f32 %v827_v42, %v2386_v25 }
 0x19a   : > { %v2391_v29 = vpop.f32.mrf.mxu0 }
 0x19b   : > { %v849_v47 = vadd.f32 %v848_v44, %v2391_v29 }
 0x19c   : > { %v2397_v34 = vpop.f32.mrf.mxu0 }
 0x19d   : > { %v829_v48 = vadd.f32 %v828_v45, %v2397_v34 }
 0x19e   : > { %v2401_v37 = vpop.f32.mrf.mxu0 }
 0x19f   : > { %v850_v59 = vadd.f32 %v849_v47, %v2401_v37 }
 0x1a0   : > { %v2405_v40 = vpop.f32.mrf.mxu0 }
 0x1a1   : > { %v830_v61 = vadd.f32 %v829_v48, %v2405_v40 }
 0x1a2   : > { %v2409_v43 = vpop.f32.mrf.mxu0 }
 0x1a3   : > { %v851_v1 = vadd.f32 %v850_v59, %v2409_v43 }
 0x1a4   : > { %v2413_v46 = vpop.f32.mrf.mxu0 }
 0x1a5   : > { %v831_v3 = vadd.f32 %v830_v61, %v2413_v46 }
 0x1a6   : > { %v2417_v57 = vpop.f32.mrf.mxu0 }
 0x1a7   : > { %v852_v7 = vadd.f32 %v851_v1, %v2417_v57 }
 0x1a8   : > { %v2421_v63 = vpop.f32.mrf.mxu0 }
 0x1a9   : > { %v832_v9 = vadd.f32 %v831_v3, %v2421_v63 }
 0x1aa   : > { %v2425_v5 = vpop.f32.mrf.mxu0 }
 0x1ab   : > { %v853_v12 = vadd.f32 %v852_v7, %v2425_v5 }
 0x1ac   : > { %v2429_v11 = vpop.f32.mrf.mxu0 }
 0x1ad   : > { %v833_v14 = vadd.f32 %v832_v9, %v2429_v11 }
 0x1ae   : > { %v2433_v15 = vpop.f32.mrf.mxu0 }
 0x1af   : > { %v834_v16 = vrot.slane %v833_v14, 4  ;;  %v854_v18 = vadd.f32 %v853_v12, %v2433_v15 }
 0x1b1   : > { %v835_v19 = vadd.f32 %v834_v16, %v833_v14  ;;  %v855_v20 = vrot.slane %v854_v18, 4 }
 0x1b3   : > { %v836_v22 = vrot.slane %v835_v19, 2  ;;  %v856_v23 = vadd.f32 %v855_v20, %v854_v18 }
 0x1b5   : > { %v837_v24 = vadd.f32 %v836_v22, %v835_v19  ;;  %v857_v26 = vrot.slane %v856_v23, 2 }
 0x1b7   : > { %v838_v27 = vrot.slane %v837_v24, 1  ;;  %v858_v30 = vadd.f32 %v857_v26, %v856_v23 }
 0x1b9   : > { %v839_v28 = vadd.f32 %v838_v27, %v837_v24  ;;  %v859_v35 = vrot.slane %v858_v30, 1 }
 0x1bb   : > { %v2436_v31 = vmul.f32 0.0078125, %v839_v28  ;;  %v860_v41 = vadd.f32 %v859_v35, %v858_v30 }
 0x1bd   : > { %v2440_v32 = vsub.f32 %v2324_v49, %v2436_v31  ;;  %v2444_v33 = vsub.f32 %v2328_v51, %v2436_v31  ;;  %v2448_v36 = vsub.f32 %v2332_v53, %v2436_v31  ;;  %v2456_v49 = vsub.f32 %v2336_v55, %v2436_v31 }
 0x1be   : > { %v2460_v51 = vsub.f32 %v2341_v58, %v2436_v31  ;;  %v2464_v44 = vmul.f32 0.0078125, %v860_v41  ;;  %v2468_v45 = vsub.f32 %v2347_v62, %v2436_v31  ;;  %v2482_v59 = vsub.f32 %v2353_v2, %v2436_v31 }
 0x1bf   : > { %v896_v38 = vmul.f32 %v2440_v32, %v2440_v32  ;;  %v898_v39 = vmul.f32 %v2444_v33, %v2444_v33  ;;  %v900_v42 = vmul.f32 %v2448_v36, %v2448_v36  ;;  %v902_v47 = vmul.f32 %v2456_v49, %v2456_v49 }
 0x1c0   : > { %v2474_v55 = vsub.f32 %v2326_v50, %v2464_v44  ;;  %v2478_v58 = vsub.f32 %v2330_v52, %v2464_v44  ;;  %v904_v62 = vmul.f32 %v2460_v51, %v2460_v51  ;;  %v2488_v1 = vsub.f32 %v2359_v6, %v2436_v31 }
 0x1c1   : > { %v928_v53 = vadd.f32 %v898_v39, %v896_v38  ;;  %v906_v50 = vmul.f32 %v2468_v45, %v2468_v45  ;;  %v2494_v52 = vsub.f32 %v2334_v54, %v2464_v44  ;;  %v2502_v9 = vsub.f32 %v2365_v10, %v2436_v31 }
 0x1c2   : > { %v897_v2 = vmul.f32 %v2474_v55, %v2474_v55  ;;  %v899_v7 = vmul.f32 %v2478_v58, %v2478_v58  ;;  %v908_v6 = vmul.f32 %v2482_v59, %v2482_v59  ;;  %v2508_v14 = vsub.f32 %v2338_v56, %v2464_v44 }
 0x1c3   : > { %v929_v48 = vadd.f32 %v928_v53, %v900_v42  ;;  %v2512_v54 = vsub.f32 %v2376_v17, %v2436_v31  ;;  %v910_v16 = vmul.f32 %v2488_v1, %v2488_v1  ;;  %v2518_v10 = vsub.f32 %v2344_v60, %v2464_v44 }
 0x1c4   : > { %v901_v19 = vmul.f32 %v2494_v52, %v2494_v52  ;;  %v949_v20 = vadd.f32 %v899_v7, %v897_v2  ;;  %v2524_v56 = vsub.f32 %v2386_v25, %v2436_v31  ;;  %v912_v17 = vmul.f32 %v2502_v9, %v2502_v9 }
 0x1c5   : > { %v930_v61 = vadd.f32 %v929_v48, %v902_v47  ;;  %v2530_v23 = vsub.f32 %v2350_v0, %v2464_v44  ;;  %v903_v60 = vmul.f32 %v2508_v14, %v2508_v14  ;;  %v2536_v26 = vsub.f32 %v2397_v34, %v2436_v31 }
 0x1c6   : > { %v950_v24 = vadd.f32 %v949_v20, %v901_v19  ;;  %v914_v25 = vmul.f32 %v2512_v54, %v2512_v54  ;;  %v2542_v28 = vsub.f32 %v2356_v4, %v2464_v44  ;;  %v905_v0 = vmul.f32 %v2518_v10, %v2518_v10 }
 0x1c7   : > { %v931_v3 = vadd.f32 %v930_v61, %v904_v62  ;;  %v2548_v35 = vsub.f32 %v2405_v40, %v2436_v31  ;;  %v916_v34 = vmul.f32 %v2524_v56, %v2524_v56  ;;  %v2554_v39 = vsub.f32 %v2362_v8, %v2464_v44 }
 0x1c8   : > { %v951_v30 = vadd.f32 %v950_v24, %v903_v60  ;;  %v907_v4 = vmul.f32 %v2530_v23, %v2530_v23  ;;  %v2560_v42 = vsub.f32 %v2413_v46, %v2436_v31  ;;  %v918_v40 = vmul.f32 %v2536_v26, %v2536_v26 }
 0x1c9   : > { %v932_v12 = vadd.f32 %v931_v3, %v906_v50  ;;  %v2566_v47 = vsub.f32 %v2370_v13, %v2464_v44  ;;  %v909_v8 = vmul.f32 %v2542_v28, %v2542_v28  ;;  %v2572_v62 = vsub.f32 %v2421_v63, %v2436_v31 }
 0x1ca   : > { %v952_v41 = vadd.f32 %v951_v30, %v905_v0  ;;  %v920_v46 = vmul.f32 %v2548_v35, %v2548_v35  ;;  %v2578_v50 = vsub.f32 %v2381_v21, %v2464_v44  ;;  %v911_v13 = vmul.f32 %v2554_v39, %v2554_v39 }
 0x1cb   : > { %v933_v18 = vadd.f32 %v932_v12, %v908_v6  ;;  %v2584_v2 = vsub.f32 %v2429_v11, %v2436_v31  ;;  %v922_v63 = vmul.f32 %v2560_v42, %v2560_v42  ;;  %v2590_v6 = vsub.f32 %v2391_v29, %v2464_v44 }
 0x1cc   : > { %v953_v48 = vadd.f32 %v952_v41, %v907_v4  ;;  %v913_v21 = vmul.f32 %v2566_v47, %v2566_v47  ;;  %v2598_v11 = vsub.f32 %v2401_v37, %v2464_v44  ;;  %v915_v31 = vmul.f32 %v2578_v50, %v2578_v50 }
 0x1cd   : > { %v934_v22 = vadd.f32 %v933_v18, %v910_v16  ;;  %v924_v16 = vmul.f32 %v2572_v62, %v2572_v62  ;;  %v926_v29 = vmul.f32 %v2584_v2, %v2584_v2  ;;  %v2612_v37 = vsub.f32 %v2417_v57, %v2464_v44 }
 0x1ce   : > { %v954_v3 = vadd.f32 %v953_v48, %v909_v8  ;;  %v2618_v30 = vsub.f32 %v2425_v5, %v2464_v44  ;;  %v2624_v4 = vsub.f32 %v2433_v15, %v2464_v44 }
 0x1cf   : > { %v935_v27 = vadd.f32 %v934_v22, %v912_v17  ;;  %v2606_v17 = vsub.f32 %v2409_v43, %v2464_v44  ;;  %v917_v22 = vmul.f32 %v2590_v6, %v2590_v6  ;;  %v923_v57 = vmul.f32 %v2612_v37, %v2612_v37 }
 0x1d0   : > { %v955_v12 = vadd.f32 %v954_v3, %v911_v13  ;;  %v927_v48 = vmul.f32 %v2624_v4, %v2624_v4 }
 0x1d1   : > { %v936_v38 = vadd.f32 %v935_v27, %v914_v25  ;;  %v919_v25 = vmul.f32 %v2598_v11, %v2598_v11  ;;  %v921_v43 = vmul.f32 %v2606_v17, %v2606_v17 }
 0x1d2   : > { %v956_v19 = vadd.f32 %v955_v12, %v913_v21 }
 0x1d3   : > { %v937_v53 = vadd.f32 %v936_v38, %v916_v34 }
 0x1d4   : > { %v957_v60 = vadd.f32 %v956_v19, %v915_v31 }
 0x1d5   : > { %v938_v61 = vadd.f32 %v937_v53, %v918_v40  ;;  %v925_v53 = vmul.f32 %v2618_v30, %v2618_v30 }
 0x1d6   : > { %v958_v27 = vadd.f32 %v957_v60, %v917_v22  ;;  %v983_v22 = vlaneseq }
 0x1d7   : > { %v939_v7 = vadd.f32 %v938_v61, %v920_v46 }
 0x1d8   : > { %v959_v34 = vadd.f32 %v958_v27, %v919_v25 }
 0x1d9   : > { %v940_v18 = vadd.f32 %v939_v7, %v922_v63 }
 0x1da   : > { %v960_v41 = vadd.f32 %v959_v34, %v921_v43 }
 0x1db   : > { %v941_v20 = vadd.f32 %v940_v18, %v924_v16 }
 0x1dc   : > { %v961_v8 = vadd.f32 %v960_v41, %v923_v57 }
 0x1dd   : > { %v942_v24 = vadd.f32 %v941_v20, %v926_v29  ;;  %v2092_v29 = vmov 1966171168  }
 0x1de   : > { %v962_v46 = vadd.f32 %v961_v8, %v925_v53  ;;  %v981_v20 = vunpack.c.l.s4 %v2092_v29  ;;  %v1039_v53 = vld [vmem:[%s390_s8] sm:$0x3] }
 0x1df   : > { %v943_v0 = vrot.slane %v942_v24, 4 }
 0x1e0   : > { %v963_v61 = vadd.f32 %v962_v46, %v927_v48  ;;  %v982_v60 = vunpack.c.0.s8 %v981_v20 }
 0x1e1   : > { %v944_v38 = vadd.f32 %v943_v0, %v942_v24  ;;  %v984_v24 = vshrl.u32 %v983_v22, 7 }
 0x1e2   : > { %v964_v3 = vrot.slane %v963_v61, 4 }
 0x1e3   : > { %v945_v40 = vrot.slane %v944_v38, 2  ;;  %v985_v27 = vsub.s32 %v982_v60, %v984_v24  ;;  %v999_v41 = vsub.s32 0, %v984_v24 }
 0x1e4   : > { %v965_v63 = vadd.f32 %v964_v3, %v963_v61 }
 0x1e5   : > { %v946_v5 = vadd.f32 %v945_v40, %v944_v38  ;;  %v972_v38 = vld [vmem:[%s2276_s11] sm:$0x3]  ;;  %v1003_v40 = vsub.s32 1, %v984_v24  ;;  %v2642_v46 = vrot.slane %v1039_v53, %v999_v41 }
 0x1e6   : > { %v966_v44 = vrot.slane %v965_v63, 2 }
 0x1e7   : > { %v947_v13 = vrot.slane %v946_v5, 1  ;;  %v2644_v61 = vrot.slane %v1039_v53, %v1003_v40 }
 0x1e8   : > { %v967_v7 = vadd.f32 %v966_v44, %v965_v63 }
 0x1e9   : > { %v948_v15 = vadd.f32 %v947_v13, %v946_v5 }
 0x1ea   : > { %v968_v12 = vrot.slane %v967_v7, 1 }
 0x1eb   : > { %v970_v21 = vmul.f32 0.0078125, %v948_v15 }
 0x1ec   : > { %v969_v16 = vadd.f32 %v968_v12, %v967_v7 }
 0x1ed   : > { %v973_v18 = vadd.f32 1e-05, %v970_v21 }
 0x1ee   : > { %v971_v31 = vmul.f32 0.0078125, %v969_v16 }
 0x1ef   : > { %1881 = vrsqrt.f32 %v973_v18 }
 0x1f0   : > { %v974_v19 = vadd.f32 1e-05, %v971_v31 }
 0x1f2   : > { %1883 = vrsqrt.f32 %v974_v19 }
 0x1fc   : > { %v1882_v25 = vpop.eup %1881 }
 0x1ff   : > { %v1884_v0 = vpop.eup %1883 }
 0x200   : > { %v979_v43 = vcombine.low %v1882_v25, %v1884_v0 }
 0x202   : > { %v986_v34 = vrot.slane %v979_v43, %v985_v27 }
 0x204   : > { %v993_v57 = vrot.slane %v986_v34, %v985_v27 }
 0x206   : > { %v995_v8 = vmul.f32 %v993_v57, %v972_v38 }
 0x208   : > { %v2638_v5 = vrot.slane %v995_v8, %v999_v41  ;;  %v2640_v48 = vrot.slane %v995_v8, %v1003_v40 }
 0x20a   : > { %v1008_v13 = vmul.f32 %v2640_v48, %v2474_v55  ;;  %v1010_v3 = vmul.f32 %v2640_v48, %v2478_v58  ;;  %v1007_v63 = vmul.f32 %v2638_v5, %v2440_v32  ;;  %v1009_v15 = vmul.f32 %v2638_v5, %v2444_v33 }
 0x20b   : > { %v1012_v44 = vmul.f32 %v2640_v48, %v2494_v52  ;;  %v1014_v7 = vmul.f32 %v2640_v48, %v2508_v14  ;;  %v1011_v58 = vmul.f32 %v2638_v5, %v2448_v36  ;;  %v1013_v52 = vmul.f32 %v2638_v5, %v2456_v49 }
 0x20c   : > { %v1052_v21 = vadd.f32 %v2644_v61, %v1008_v13  ;;  %v1054_v12 = vadd.f32 %v2644_v61, %v1010_v3  ;;  %v1051_v55 = vadd.f32 %v2642_v46, %v1007_v63  ;;  %v1053_v32 = vadd.f32 %v2642_v46, %v1009_v15 }
 0x20d   : > { %v1056_v16 = vadd.f32 %v2644_v61, %v1012_v44  ;;  %v1058_v33 = vadd.f32 %v2644_v61, %v1014_v7  ;;  %v1016_v60 = vmul.f32 %v2640_v48, %v2518_v10  ;;  %v1018_v36 = vmul.f32 %v2640_v48, %v2530_v23 }
 0x20e   : > { %v1084_v18 = vmax.f32 %v1052_v21, 0.0  ;;  %v1086_v14 = vmax.f32 %v1054_v12, 0.0  ;;  %v1083_v31 = vmax.f32 %v1051_v55, 0.0  ;;  %v1085_v19 = vmax.f32 %v1053_v32, 0.0 }
 0x20f   : > { %v1088_v29 = vmax.f32 %v1056_v16, 0.0  ;;  %v1090_v20 = vmax.f32 %v1058_v33, 0.0  ;;  %v1055_v25 = vadd.f32 %v2642_v46, %v1011_v58  ;;  %v1057_v27 = vadd.f32 %v2642_v46, %v1013_v52 }
 0x210   : > { %v1132_v22 = vpack.c.bf16 %v1086_v14, %v1084_v18  ;;  %v1131_v24 = vpack.c.bf16 %v1085_v19, %v1083_v31  ;;  %v1060_v0 = vadd.f32 %v2644_v61, %v1016_v60  ;;  %v1062_v43 = vadd.f32 %v2644_v61, %v1018_v36 }
 0x211   : > { %v1134_v49 = vpack.c.bf16 %v1090_v20, %v1088_v29  ;;  %v1087_v34 = vmax.f32 %v1055_v25, 0.0  ;;  %v1089_v38 = vmax.f32 %v1057_v27, 0.0  ;;  %v1015_v10 = vmul.f32 %v2638_v5, %v2460_v51 }
 0x212   : > { %1307 = vmatprep.mubr.bf16.mxu1 %v1132_v22  ;;  %v1017_v23 = vmul.f32 %v2638_v5, %v2468_v45  ;;  %v1092_v57 = vmax.f32 %v1060_v0, 0.0  ;;  %v1094_v41 = vmax.f32 %v1062_v43, 0.0  ;;  %v1020_v40 = vmul.f32 %v2640_v48, %v2542_v28 }
 0x213   : > { %1308 = vmatmul.mubr.bf16.vlgmr.msra.gmra.mxu1 %v1131_v24  ;;  %v1022_v53 = vmul.f32 %v2640_v48, %v2554_v39  ;;  %v1133_v8 = vpack.c.bf16 %v1089_v38, %v1087_v34  ;;  %v1059_v13 = vadd.f32 %v2642_v46, %v1015_v10  ;;  %v1019_v28 = vmul.f32 %v2638_v5, %v2482_v59 }
 0x214   : > { %1315 = vmatprep.mubr.bf16.mxu1 %v1134_v49  ;;  %v1061_v3 = vadd.f32 %v2642_v46, %v1017_v23  ;;  %v1136_v63 = vpack.c.bf16 %v1094_v41, %v1092_v57  ;;  %v1064_v15 = vadd.f32 %v2644_v61, %v1020_v40  ;;  %v1021_v39 = vmul.f32 %v2638_v5, %v2488_v1 }
 0x215   : > { %v1066_v51 = vadd.f32 %v2644_v61, %v1022_v53  ;;  %v1091_v45 = vmax.f32 %v1059_v13, 0.0  ;;  %v1024_v12 = vmul.f32 %v2640_v48, %v2566_v47  ;;  %v1026_v55 = vmul.f32 %v2640_v48, %v2578_v50 }
 0x216   : > { %v1093_v44 = vmax.f32 %v1061_v3, 0.0  ;;  %v1096_v7 = vmax.f32 %v1064_v15, 0.0  ;;  %v1063_v32 = vadd.f32 %v2642_v46, %v1019_v28  ;;  %v1065_v16 = vadd.f32 %v2642_v46, %v1021_v39 }
 0x217   : > { %v1098_v21 = vmax.f32 %v1066_v51, 0.0  ;;  %v1068_v52 = vadd.f32 %v2644_v61, %v1024_v12  ;;  %v1070_v59 = vadd.f32 %v2644_v61, %v1026_v55  ;;  %v1023_v47 = vmul.f32 %v2638_v5, %v2502_v9 }
 0x218   : > { %v1135_v58 = vpack.c.bf16 %v1093_v44, %v1091_v45  ;;  %v1095_v1 = vmax.f32 %v1063_v32, 0.0  ;;  %v1097_v18 = vmax.f32 %v1065_v16, 0.0  ;;  %v1025_v50 = vmul.f32 %v2638_v5, %v2512_v54  ;;  %v1115_v16 = vld [vmem:[#allocation10] sm:$0xff] }
 0x219   : > { %v1138_v33 = vpack.c.bf16 %v1098_v21, %v1096_v7  ;;  %v1100_v14 = vmax.f32 %v1068_v52, 0.0  ;;  %v1102_v31 = vmax.f32 %v1070_v59, 0.0  ;;  %v1028_v19 = vmul.f32 %v2640_v48, %v2590_v6 }
 0x21a   : > { %v1030_v29 = vmul.f32 %v2640_v48, %v2598_v11  ;;  %v1137_v20 = vpack.c.bf16 %v1097_v18, %v1095_v1  ;;  %v1067_v22 = vadd.f32 %v2642_v46, %v1023_v47  ;;  %v1069_v60 = vadd.f32 %v2642_v46, %v1025_v50 }
 0x21b   : > { %1316 = vmatmul.mubr.bf16.gmra.mxu1 %v1133_v8  ;;  %v1140_v36 = vpack.c.bf16 %v1102_v31, %v1100_v14  ;;  %v1072_v24 = vadd.f32 %v2644_v61, %v1028_v19  ;;  %v1027_v6 = vmul.f32 %v2638_v5, %v2524_v56  ;;  %v1029_v11 = vmul.f32 %v2638_v5, %v2536_v26 }
 0x21c   : > { %1323 = vmatprep.mubr.bf16.mxu1 %v1136_v63  ;;  %v1074_v9 = vadd.f32 %v2644_v61, %v1030_v29  ;;  %v1099_v54 = vmax.f32 %v1067_v22, 0.0  ;;  %v1101_v25 = vmax.f32 %v1069_v60, 0.0  ;;  %v1032_v0 = vmul.f32 %v2640_v48, %v2606_v17  ;;  %v1118_v29 = vld [vmem:[#allocation10 + $0x18] sm:$0xff] }
 0x21d   : > { %v1104_v27 = vmax.f32 %v1072_v24, 0.0  ;;  %v1034_v43 = vmul.f32 %v2640_v48, %v2612_v37  ;;  %v1071_v38 = vadd.f32 %v2642_v46, %v1027_v6  ;;  %v1073_v10 = vadd.f32 %v2642_v46, %v1029_v11  ;;  %v1119_v24 = vld [vmem:[#allocation10 + $0x20] sm:$0xff]  ;;  %v1120_v11 = vld [vmem:[#allocation10 + $0x28] sm:$0xff] }
 0x21e   : > { %v1106_v49 = vmax.f32 %v1074_v9, 0.0  ;;  %v1139_v34 = vpack.c.bf16 %v1101_v25, %v1099_v54  ;;  %v1076_v57 = vadd.f32 %v2644_v61, %v1032_v0  ;;  %v1031_v17 = vmul.f32 %v2638_v5, %v2548_v35 }
 0x21f   : > { %v1078_v56 = vadd.f32 %v2644_v61, %v1034_v43  ;;  %v1103_v26 = vmax.f32 %v1071_v38, 0.0  ;;  %v1105_v41 = vmax.f32 %v1073_v10, 0.0  ;;  %v1033_v37 = vmul.f32 %v2638_v5, %v2560_v42 }
 0x220   : > { %v1142_v23 = vpack.c.bf16 %v1106_v49, %v1104_v27  ;;  %v1038_v40 = vmul.f32 %v2640_v48, %v2624_v4  ;;  %v1108_v53 = vmax.f32 %v1076_v57, 0.0  ;;  %v1036_v13 = vmul.f32 %v2640_v48, %v2618_v30 }
 0x221   : > { %v1110_v8 = vmax.f32 %v1078_v56, 0.0  ;;  %v1141_v3 = vpack.c.bf16 %v1105_v41, %v1103_v26  ;;  %v1075_v63 = vadd.f32 %v2642_v46, %v1031_v17  ;;  %v1077_v15 = vadd.f32 %v2642_v46, %v1033_v37  ;;  %v1122_v56 = vld [vmem:[#allocation10 + $0x38] sm:$0xff] }
 0x222   : > { %v1082_v51 = vadd.f32 %v2644_v61, %v1038_v40  ;;  %v1080_v35 = vadd.f32 %v2644_v61, %v1036_v13  ;;  %v1035_v4 = vmul.f32 %v2638_v5, %v2572_v62  ;;  %v1037_v30 = vmul.f32 %v2638_v5, %v2584_v2  ;;  %v1116_v5 = vld [vmem:[#allocation10 + $0x8] sm:$0xff]  ;;  %v1123_v40 = vld [vmem:[#allocation10 + $0x40] sm:$0xff] }
 0x223   : > { %1324 = vmatmul.mubr.bf16.gmra.mxu1 %v1135_v58  ;;  %v1144_v45 = vpack.c.bf16 %v1110_v8, %v1108_v53  ;;  %v1107_v42 = vmax.f32 %v1075_v63, 0.0  ;;  %v1109_v44 = vmax.f32 %v1077_v15, 0.0  ;;  %v1124_v63 = vld [vmem:[#allocation10 + $0x48] sm:$0xff] }
 0x224   : > { %1331 = vmatprep.mubr.bf16.mxu1 %v1138_v33  ;;  %v1114_v48 = vmax.f32 %v1082_v51, 0.0  ;;  %v1112_v28 = vmax.f32 %v1080_v35, 0.0  ;;  %v1079_v7 = vadd.f32 %v2642_v46, %v1035_v4  ;;  %v1081_v21 = vadd.f32 %v2642_v46, %v1037_v30  ;;  %v1117_v46 = vld [vmem:[#allocation10 + $0x10] sm:$0xff] }
 0x225   : > { %v1143_v39 = vpack.c.bf16 %v1109_v44, %v1107_v42  ;;  %v1125_v42 = vld [vmem:[#allocation10 + $0x50] sm:$0xff] }
 0x226   : > { %v1146_v12 = vpack.c.bf16 %v1114_v48, %v1112_v28  ;;  %v1111_v61 = vmax.f32 %v1079_v7, 0.0  ;;  %v1113_v55 = vmax.f32 %v1081_v21, 0.0  ;;  %v1126_v28 = vld [vmem:[#allocation10 + $0x58] sm:$0xff] }
 0x228   : > { %v1145_v58 = vpack.c.bf16 %v1113_v55, %v1111_v61  ;;  %v1127_v61 = vld [vmem:[#allocation10 + $0x60] sm:$0xff] }
 0x22b   : > { %1332 = vmatmul.mubr.bf16.gmra.mxu1 %v1137_v20 }
 0x22c   : > { %1339 = vmatprep.mubr.bf16.mxu1 %v1140_v36 }
 0x233   : > { %1340 = vmatmul.mubr.bf16.gmra.mxu1 %v1139_v34  ;;  %v1121_v34 = vld [vmem:[#allocation10 + $0x30] sm:$0xff] }
 0x234   : > { %1347 = vmatprep.mubr.bf16.mxu1 %v1142_v23 }
 0x23b   : > { %1348 = vmatmul.mubr.bf16.gmra.mxu1 %v1141_v3 }
 0x23c   : > { %1355 = vmatprep.mubr.bf16.mxu1 %v1144_v45 }
 0x243   : > { %1356 = vmatmul.mubr.bf16.gmra.mxu1 %v1143_v39 }
 0x244   : > { %1363 = vmatprep.mubr.bf16.mxu1 %v1146_v12 }
 0x24b   : > { %1364 = vmatmul.mubr.bf16.gmra.mxu1 %v1145_v58 }
 0x2d3   : > { %v1654_v32 = vpop.f32.mrf.mxu1 }
 0x2d5   : > { %v1655_v62 = vpop.f32.mrf.mxu1 }
 0x2d6   : > { %v1656_v33 = vadd.f32 %v1655_v62, %v1654_v32  ;;  %v1128_v62 = vld [vmem:[#allocation10 + $0x68] sm:$0xff] }
 0x2d7   : > { %v1657_v52 = vpop.f32.mrf.mxu1 }
 0x2d8   : > { %v1372_v2 = vadd.f32 %v1656_v33, %v1115_v16 }
 0x2d9   : > { %v1658_v59 = vpop.f32.mrf.mxu1 }
 0x2da   : > { %1388 = vst [vmem:[#allocation10] sm:$0xff] %v1372_v2  ;;  %v1659_v1 = vadd.f32 %v1658_v59, %v1657_v52  ;;  %v1129_v59 = vld [vmem:[#allocation10 + $0x70] sm:$0xff] }
 0x2db   : > { %v1660_v18 = vpop.f32.mrf.mxu1 }
 0x2dc   : > { %v1373_v47 = vadd.f32 %v1659_v1, %v1116_v5 }
 0x2dd   : > { %v1661_v50 = vpop.f32.mrf.mxu1 }
 0x2de   : > { %1389 = vst [vmem:[#allocation10 + $0x8] sm:$0xff] %v1373_v47  ;;  %v1662_v14 = vadd.f32 %v1661_v50, %v1660_v18  ;;  %v1130_v50 = vld [vmem:[#allocation10 + $0x78] sm:$0xff] }
 0x2df   : > { %v1663_v31 = vpop.f32.mrf.mxu1 }
 0x2e0   : > { %v1374_v19 = vadd.f32 %v1662_v14, %v1117_v46 }
 0x2e1   : > { %v1664_v20 = vpop.f32.mrf.mxu1 }
 0x2e2   : > { %1390 = vst [vmem:[#allocation10 + $0x10] sm:$0xff] %v1374_v19  ;;  %v1665_v22 = vadd.f32 %v1664_v20, %v1663_v31 }
 0x2e3   : > { %v1666_v60 = vpop.f32.mrf.mxu1 }
 0x2e4   : > { %v1375_v36 = vadd.f32 %v1665_v22, %v1118_v29 }
 0x2e5   : > { %v1667_v9 = vpop.f32.mrf.mxu1 }
 0x2e6   : > { %1391 = vst [vmem:[#allocation10 + $0x18] sm:$0xff] %v1375_v36  ;;  %v1668_v54 = vadd.f32 %v1667_v9, %v1666_v60 }
 0x2e7   : > { %v1669_v25 = vpop.f32.mrf.mxu1 }
 0x2e8   : > { %v1376_v6 = vadd.f32 %v1668_v54, %v1119_v24 }
 0x2e9   : > { %v1670_v27 = vpop.f32.mrf.mxu1 }
 0x2ea   : > { %1392 = vst [vmem:[#allocation10 + $0x20] sm:$0xff] %v1376_v6  ;;  %v1671_v49 = vadd.f32 %v1670_v27, %v1669_v25 }
 0x2eb   : > { %v1672_v0 = vpop.f32.mrf.mxu1 }
 0x2ec   : > { %v1377_v43 = vadd.f32 %v1671_v49, %v1120_v11 }
 0x2ed   : > { %v1673_v38 = vpop.f32.mrf.mxu1 }
 0x2ee   : > { %1393 = vst [vmem:[#allocation10 + $0x28] sm:$0xff] %v1377_v43  ;;  %v1674_v10 = vadd.f32 %v1673_v38, %v1672_v0 }
 0x2ef   : > { %v1675_v23 = vpop.f32.mrf.mxu1 }
 0x2f0   : > { %v1378_v57 = vadd.f32 %v1674_v10, %v1121_v34 }
 0x2f1   : > { %v1676_v26 = vpop.f32.mrf.mxu1 }
 0x2f2   : > { %1394 = vst [vmem:[#allocation10 + $0x30] sm:$0xff] %v1378_v57  ;;  %v1677_v41 = vadd.f32 %v1676_v26, %v1675_v23 }
 0x2f3   : > { %v1678_v17 = vpop.f32.mrf.mxu1 }
 0x2f4   : > { %v1379_v37 = vadd.f32 %v1677_v41, %v1122_v56 }
 0x2f5   : > { %v1679_v53 = vpop.f32.mrf.mxu1 }
 0x2f6   : > { %1395 = vst [vmem:[#allocation10 + $0x38] sm:$0xff] %v1379_v37  ;;  %v1680_v8 = vadd.f32 %v1679_v53, %v1678_v17 }
 0x2f7   : > { %v1681_v13 = vpop.f32.mrf.mxu1 }
 0x2f8   : > { %v1380_v3 = vadd.f32 %v1680_v8, %v1123_v40 }
 0x2f9   : > { %v1682_v15 = vpop.f32.mrf.mxu1 }
 0x2fa   : > { %1396 = vst [vmem:[#allocation10 + $0x40] sm:$0xff] %v1380_v3  ;;  %v1683_v51 = vadd.f32 %v1682_v15, %v1681_v13 }
 0x2fb   : > { %v1684_v45 = vpop.f32.mrf.mxu1 }
 0x2fc   : > { %v1381_v35 = vadd.f32 %v1683_v51, %v1124_v63 }
 0x2fd   : > { %v1685_v44 = vpop.f32.mrf.mxu1 }
 0x2fe   : > { %1397 = vst [vmem:[#allocation10 + $0x48] sm:$0xff] %v1381_v35  ;;  %v1686_v4 = vadd.f32 %v1685_v44, %v1684_v45 }
 0x2ff   : > { %v1687_v30 = vpop.f32.mrf.mxu1 }
 0x300   : > { %v1382_v48 = vadd.f32 %v1686_v4, %v1125_v42 }
 0x301   : > { %v1688_v39 = vpop.f32.mrf.mxu1 }
 0x302   : > { %1398 = vst [vmem:[#allocation10 + $0x50] sm:$0xff] %v1382_v48  ;;  %v1689_v7 = vadd.f32 %v1688_v39, %v1687_v30 }
 0x303   : > { %v1690_v21 = vpop.f32.mrf.mxu1 }
 0x304   : > { %v1383_v12 = vadd.f32 %v1689_v7, %v1126_v28 }
 0x305   : > { %v1691_v55 = vpop.f32.mrf.mxu1 }
 0x306   : > { %1399 = vst [vmem:[#allocation10 + $0x58] sm:$0xff] %v1383_v12  ;;  %v1692_v58 = vadd.f32 %v1691_v55, %v1690_v21 }
 0x307   : > { %v1693_v32 = vpop.f32.mrf.mxu1 }
 0x308   : > { %v1384_v16 = vadd.f32 %v1692_v58, %v1127_v61 }
 0x309   : > { %v1694_v33 = vpop.f32.mrf.mxu1 }
 0x30a   : > { %1400 = vst [vmem:[#allocation10 + $0x60] sm:$0xff] %v1384_v16  ;;  %v1695_v52 = vadd.f32 %v1694_v33, %v1693_v32 }
 0x30b   : > { %v1696_v2 = vpop.f32.mrf.mxu1 }
 0x30c   : > { %v1385_v5 = vadd.f32 %v1695_v52, %v1128_v62 }
 0x30d   : > { %v1697_v1 = vpop.f32.mrf.mxu1 }
 0x30e   : > { %1401 = vst [vmem:[#allocation10 + $0x68] sm:$0xff] %v1385_v5  ;;  %v1698_v18 = vadd.f32 %v1697_v1, %v1696_v2 }
 0x30f   : > { %v1699_v47 = vpop.f32.mrf.mxu1 }
 0x310   : > { %v1386_v46 = vadd.f32 %v1698_v18, %v1129_v59 }
 0x311   : > { %v1700_v14 = vpop.f32.mrf.mxu1 }
 0x312   : > { %1402 = vst [vmem:[#allocation10 + $0x70] sm:$0xff] %v1386_v46  ;;  %v1701_v31 = vadd.f32 %v1700_v14, %v1699_v47 }
 0x314   : > { %v1387_v19 = vadd.f32 %v1701_v31, %v1130_v50 }
 0x316   : > { %1403 = vst [vmem:[#allocation10 + $0x78] sm:$0xff] %v1387_v19 }
 0x317   : > { %2008 = shalt.err (!%p2005_p11)
}
 0x318   : > { %s2094_s0 = smov 128   ;;  %s2095_s29 = smov 8  }
 0x319   : > { %1713 = dma.vmem_to_hbm [thread:$0]  (%p1733_p5), %s1414_s16, 2048, %s2777_s5, [#allocation4], %s2094_s0, %s2094_s0, %s2095_s29  }
 0x31a   : > { %2056 = dma.done.wait (%p1733_p5), [#allocation4], 2048  }
 0x31b   : > { %2058 = vsyncadd (%p1733_p5), [#allocation4], 4294965248 }
 0x31c PF: > { %s23_s23 = sadd.s32 1, %s2081_s23   ;;  %s2788_s18 = smov %s2065_s19 }
 0x31d   : > { %p20_p12 = scmp.ge.s32.totalorder %s23_s23, 4   ;;  %s2789_s19 = smov %s2069_s20 }
 0x31e   : > { %s2790_s20 = smov %s2175_s30  ;;  %s2791_s21 = smov %s2077_s22 }
 0x31f   : > { %s2792_s22 = smov %s2794_s24  ;;  %22 = sbr.rel (!%p20_p12) target bundleno = 10 (0xa), region = 114 }
 0x324   :  { %1429 = vsyncpa [#allocation3], 1 }
 0x325   :  { %1431 = vsyncpa [#allocation3 + $0x1], 1 }
 0x326   :  { %1432 = vsyncpa [#allocation6], 1 }
 0x327   :  { %1434 = vsyncpa [#allocation6 + $0x1], 1 }
 0x328   :  { %1435 = vsyncpa [#allocation9], 1 }
 0x329   :  { %1437 = vsyncpa [#allocation9 + $0x1], 1 }
 0x32a   :  { %1438 = vsyncpa [#allocation4], 1 }
 0x32b   :  { %1440 = vsyncpa [#allocation4 + $0x1], 1 }

</bundles_post_ra>
